<compile_context>
chip_gen: v5e
topology: v5e:2x2
jax: 0.10.0
libtpu: 0.0.40
codegen_flags: <defaults>
</compile_context>

<pallas_src>
import numpy as np
import jax
import jax.numpy as jnp
from jax.experimental import pallas as pl
from jax.experimental.pallas import tpu as pltpu


def _round_up(x, m):
    return ((x + m - 1) // m) * m


# ----------------------------- Pallas kernel --------------------------------
def sparse_conv_kernel(g_ref, w_ref, o_ref):
    # g_ref: (tn, K*Cin)       bf16 gathered neighbor features for tn output rows
    # w_ref: (K*Cin, Cout_pad) bf16 folded weights (resident across N tiles)
    # o_ref: (tn, Cout_pad)    f32 lane-dense output tile
    o_ref[...] = jnp.dot(g_ref[...], w_ref[...],
                         preferred_element_type=jnp.float32)


def sparse_conv_pallas(gathered_flat, w_flat, cout, *, max_tile_n=512):
    """gathered_flat: [N, K*Cin], w_flat: [K*Cin, Cout] -> [N, Cout] f32."""
    N, KC = gathered_flat.shape
    cout_pad = _round_up(cout, 128)            # lane-dense output stores

    g = gathered_flat.astype(jnp.bfloat16)     # bf16 MXU inputs, f32 accumulation
    w = jnp.pad(w_flat.astype(jnp.bfloat16), ((0, 0), (0, cout_pad - cout)))

    # N tiling: single tile for small N, else max_tile_n rows per grid step.
    # NOTE: re-derive max_tile_n per TPU generation (v7x has only 64 MiB VMEM).
    tn = min(max_tile_n, _round_up(N, 16))
    n_pad = _round_up(N, tn)
    g = jnp.pad(g, ((0, n_pad - N), (0, 0)))

    out = pl.pallas_call(
        sparse_conv_kernel,
        out_shape=jax.ShapeDtypeStruct((n_pad, cout_pad), jnp.float32),
        grid_spec=pltpu.PrefetchScalarGridSpec(
            num_scalar_prefetch=0,
            grid=(n_pad // tn,),
            in_specs=[
                pl.BlockSpec((tn, KC), lambda i: (i, 0)),
                # constant index_map -> folded weights stay resident in VMEM
                pl.BlockSpec((KC, cout_pad), lambda i: (0, 0)),
            ],
            out_specs=pl.BlockSpec((tn, cout_pad), lambda i: (i, 0)),
        ),
        compiler_params=pltpu.CompilerParams(
            dimension_semantics=("parallel",)),
    )(g, w)
    return out[:N, :cout]


# ------------------------------- glue ----------------------------------------
def build_kernel_map(coords_np, offsets):
    """Vectorized neighbor-map build (no Python dict loops).
    coords_np: [N, 1+D] int.  offsets: [K, D] int.
    Returns nbr_idx [K, N] int32; sentinel N (points at an appended zero
    feature row) when no neighbor exists."""
    coords = np.asarray(coords_np, dtype=np.int64)
    offs = np.asarray(offsets, dtype=np.int64)
    N, dp1 = coords.shape
    K = offs.shape[0]

    # query coordinates for every (kernel offset, output point)
    q = np.broadcast_to(coords, (K, N, dp1)).copy()
    q[:, :, 1:] += offs[:, None, :]

    # pack coordinates into unique int64 keys (mixed radix over the value range)
    lo = np.minimum(coords.min(axis=0), q.reshape(-1, dp1).min(axis=0))
    hi = np.maximum(coords.max(axis=0), q.reshape(-1, dp1).max(axis=0))
    spans = hi - lo + 1

    def pack(c):
        key = np.zeros(c.shape[:-1], dtype=np.int64)
        for d in range(dp1):
            key = key * spans[d] + (c[..., d] - lo[d])
        return key

    in_keys = pack(coords)                            # [N]
    q_keys = pack(q)                                  # [K, N]
    order = np.argsort(in_keys, kind="stable")
    sorted_keys = in_keys[order]
    pos = np.clip(np.searchsorted(sorted_keys, q_keys), 0, N - 1)
    found = sorted_keys[pos] == q_keys
    return np.where(found, order[pos], N).astype(np.int32)


def sparse_conv_forward(coords_np, feats, weights, offsets):
    """SparseConv.forward: neighbor gather (glue) + one fused Pallas matmul."""
    N, Cin = feats.shape
    K, _, Cout = weights.shape
    nbr_idx = jnp.asarray(build_kernel_map(coords_np, offsets))      # [K, N]
    feats_padded = jnp.concatenate(
        [feats, jnp.zeros((1, Cin), feats.dtype)], axis=0)           # [N+1, Cin]
    # TODO(synk): for production-sized N, fuse this gather into the kernel
    # (scalar-prefetched nbr_idx in SMEM + feats resident in VMEM) to avoid
    # materializing the K-expanded [N, K*Cin] tensor in HBM.
    gathered = feats_padded[nbr_idx]                                  # [K, N, Cin]
    gathered_flat = jnp.transpose(gathered, (1, 0, 2)).reshape(N, K * Cin)
    w_flat = weights.reshape(K * Cin, Cout)                           # k-major, c-minor
    return sparse_conv_pallas(gathered_flat, w_flat, Cout)


# ------------------------------- main ----------------------------------------
if __name__ == "__main__":
    # Module config: SparseConv(in_channels=4, out_channels=8, kernel_size=3,
    #                           stride=1, dimension=2)
    Cin, Cout, ksize, D = 4, 8, 3, 2
    batch, grid_size, pts_per_batch = 2, 16, 24

    key = jax.random.PRNGKey(0)
    k_coord, k_feat, k_w = jax.random.split(key, 3)

    # deterministic sparse coordinates: unique cells on a 16x16 grid per batch
    coords_list = []
    for b in range(batch):
        perm = np.asarray(
            jax.random.permutation(jax.random.fold_in(k_coord, b),
                                   grid_size * grid_size))[:pts_per_batch]
        ys, xs = perm // grid_size, perm % grid_size
        coords_list.append(np.stack([np.full_like(ys, b), ys, xs], axis=1))
    coords_np = np.concatenate(coords_list, axis=0).astype(np.int32)   # [N, 3]
    N = coords_np.shape[0]                                             # 48

    feats = jax.random.normal(k_feat, (N, Cin), dtype=jnp.float32)
    # MinkowskiConvolution kernel: [kernel_volume, Cin, Cout], bias=False default
    K = ksize ** D
    weights = (jax.random.normal(k_w, (K, Cin, Cout), dtype=jnp.float32)
               * (1.0 / np.sqrt(Cin * K)))

    # kernel offsets of the 3x3 region (stride=1, tensor_stride=1)
    offsets = [(dy, dx) for dy in (-1, 0, 1) for dx in (-1, 0, 1)]

    out = sparse_conv_forward(coords_np, feats, weights, offsets)
    out = jax.block_until_ready(out)
    out_np = np.asarray(out)

    # pure-JAX reference of the gather/matmul/scatter semantics
    nbr_idx = jnp.asarray(build_kernel_map(coords_np, offsets))
    feats_padded = jnp.concatenate([feats, jnp.zeros((1, Cin))], axis=0)
    gathered = feats_padded[nbr_idx]
    ref_f32 = np.asarray(jnp.einsum("knc,kco->no", gathered, weights))
    # reference that sees the same bf16-rounded MXU inputs (tight tolerance)
    ref_bf16 = np.asarray(jnp.einsum(
        "knc,kco->no",
        gathered.astype(jnp.bfloat16).astype(jnp.float32),
        weights.astype(jnp.bfloat16).astype(jnp.float32)))

    assert np.allclose(out_np, ref_bf16, atol=1e-3, rtol=1e-3)
    assert np.allclose(out_np, ref_f32, atol=5e-2, rtol=5e-2)

    print("KERNEL_OK")
</pallas_src>

<mosaic_0001>
module attributes {stable_mosaic.version = 11 : i64} {
  func.func @sparse_conv_kernel(%arg0: i32, %arg1: memref<48x36xbf16, #tpu.memory_space<vmem>>, %arg2: memref<36x128xbf16, #tpu.memory_space<vmem>>, %arg3: memref<48x128xf32, #tpu.memory_space<vmem>>) attributes {dimension_semantics = [#tpu.dimension_semantics<parallel>], iteration_bounds = array<i64: 1>, scalar_prefetch = 0 : i64, scratch_operands = 0 : i64, tpu.core_type = #tpu.core_type<tc>, window_params = [{transform_indices = @transform_0, window_bounds = array<i64: 48, 36>}, {pipeline_mode = #tpu.pipeline_mode<synchronous>, transform_indices = @transform_1, window_bounds = array<i64: 36, 128>}, {transform_indices = @transform_2, window_bounds = array<i64: 48, 128>}]} {
    %c0 = arith.constant 0 : index
    %c0_0 = arith.constant 0 : index
    %0 = vector.load %arg1[%c0, %c0_0] : memref<48x36xbf16, #tpu.memory_space<vmem>>, vector<48x36xbf16>
    %c0_1 = arith.constant 0 : index
    %c0_2 = arith.constant 0 : index
    %1 = vector.load %arg2[%c0_1, %c0_2] : memref<36x128xbf16, #tpu.memory_space<vmem>>, vector<36x128xbf16>
    %cst = arith.constant dense<0.000000e+00> : vector<48x128xf32>
    %2 = tpu.matmul %0, %1, %cst {dimension_numbers = #tpu.dot_dimension_numbers<[1], [0], [0], [1], [0, 0, 1, 1], [], []>} : vector<48x36xbf16>, vector<36x128xbf16>, vector<48x128xf32> -> vector<48x128xf32>
    %c0_3 = arith.constant 0 : index
    %c0_4 = arith.constant 0 : index
    %3 = vector.load %arg3[%c0_3, %c0_4] : memref<48x128xf32, #tpu.memory_space<vmem>>, vector<48x128xf32>
    tpu.vector_store %arg3[%c0_3, %c0_4], %2 {strides = array<i32>} : memref<48x128xf32, #tpu.memory_space<vmem>>, vector<48x128xf32>,
    return
  }
  func.func @transform_0(%arg0: i32) -> (i32, i32) {
    %c0_i32 = arith.constant 0 : i32
    %c0_i32_0 = arith.constant 0 : i32
    return %arg0, %c0_i32 : i32, i32
  }
  func.func @transform_1(%arg0: i32) -> (i32, i32) {
    %c0_i32 = arith.constant 0 : i32
    %c0_i32_0 = arith.constant 0 : i32
    %c0_i32_1 = arith.constant 0 : i32
    return %c0_i32, %c0_i32_0 : i32, i32
  }
  func.func @transform_2(%arg0: i32) -> (i32, i32) {
    %c0_i32 = arith.constant 0 : i32
    %c0_i32_0 = arith.constant 0 : i32
    return %arg0, %c0_i32 : i32, i32
  }
}

</mosaic_0001>

<bundles_post_ra>
// kernel: tpu_custom_call.1
= control target key start
LH: loop header
LB: loop body
LE: loop exit
PB: predicated region body
PF: predicated region fallthrough
CT: control target
= control target key end

     0   :  { %vm64_vm0 = vcmask 1041408   ;;  %s218_s0 = inlined_call_operand.vmem [shape: bf16[48,36], index: 0, kind: input, shape index: {}]   ;;  %s219_s1 = inlined_call_operand.vmem [shape: bf16[36,128], index: 1, kind: input, shape index: {}]   ;;  %s220_s2 = inlined_call_operand.hbm [shape: f32[48,128], index: 2, kind: output, shape index: {}]  }
   0x1   :  { %v23_v0 = vld [vmem:[%s219_s1 + $0x10] sm:$0x3] }
   0x2   :  { %v48_v1 = vunpack.c.l.b16 %v23_v0 }
   0x3   :  { %7 = vsyncpa [#allocation3], 0  ;;  %v143_v4 = vld [vmem:[%s219_s1 + $0x8] sm:$0xff]  ;;  %v142_v5 = vld [vmem:[%s219_s1] sm:$0xff]  ;;  %vm54_vm1 = vcmask 293888   ;;  %s179_s1 = smov [#allocation2]  }
   0x4   :  { %v51_v2 = vpack.c.b16 %v48_v1, %v48_v1  ;;  %v139_v6 = vld [vmem:[%s218_s0] sm:$0xff]  ;;  %v140_v7 = vld [vmem:[%s218_s0 + $0x8] sm:$0xff]  ;;  %v141_v8 = vld [vmem:[%s218_s0 + $0x10] sm:$0xff]  ;;  %s102_s21 = sshll.u32 %s179_s1, 4  ;;  %s104_s0 = sshll.u32 %s220_s2, 4  ;;  %s103_s21 = int_to_ptr.vmem [resolvable:$true] %s102_s21  ;;  %s105_s0 = int_to_ptr.hbm [resolvable:$true] %s104_s0 }
   0x5   :  { %s180_s24 = smov 128   ;;  %s181_s25 = smov 8  }
   0x6   :  { %v66_v3 = vsel %vm64_vm0, %v51_v2, 0 }
   0x7   :  { %73 = vmatpush.bf16.msra.mxu0 %v66_v3  ;;  %144 = vmatpush.bf16.msra.mxu1 %v66_v3 }
   0x8   :  { %145 = vmatpush.bf16.msra.mxu2 %v66_v3 }
   0xb   :  { %74 = vmatpush.bf16.msra.mxu0 %v143_v4  ;;  %146 = vmatpush.bf16.msra.mxu1 %v143_v4 }
   0xc   :  { %147 = vmatpush.bf16.msra.mxu2 %v143_v4 }
   0xf   :  { %75 = vmatpush.bf16.msra.mxu0 %v142_v5  ;;  %148 = vmatpush.bf16.msra.mxu1 %v142_v5 }
  0x10   :  { %149 = vmatpush.bf16.msra.mxu2 %v142_v5 }
  0x12   :  { %136 = vmatmul.msk.bf16.vlgmr.msra.gmra.mxu0 %vm54_vm1, %v139_v6  ;;  %137 = vmatmul.msk.bf16.vlgmr.msra.gmra.mxu1 %vm54_vm1, %v140_v7 }
  0x13   :  { %138 = vmatmul.msk.bf16.vlgmr.msra.gmra.mxu2 %vm54_vm1, %v141_v8 }
  0x8f   :  { %v77_v9 = vpop.f32.mrf.mxu0  ;;  %v82_v10 = vpop.f32.mrf.mxu1 }
  0x90   :  { %92 = vst [vmem:[#allocation2] sm:$0xff] %v77_v9 }
  0x91   :  { %94 = vst [vmem:[#allocation2 + $0x10] sm:$0xff] %v82_v10 }
  0x96   :  { %v87_v11 = vpop.f32.mrf.mxu2 }
  0x97   :  { %96 = vst [vmem:[#allocation2 + $0x20] sm:$0xff] %v87_v11  ;;  %v79_v12 = vpop.f32.mrf.mxu0  ;;  %v84_v13 = vpop.f32.mrf.mxu1 }
  0x98   :  { %93 = vst [vmem:[#allocation2 + $0x8] sm:$0xff] %v79_v12 }
  0x99   :  { %95 = vst [vmem:[#allocation2 + $0x18] sm:$0xff] %v84_v13 }
  0x9e   :  { %v89_v14 = vpop.f32.mrf.mxu2 }
  0x9f   :  { %97 = vst [vmem:[#allocation2 + $0x28] sm:$0xff] %v89_v14 }
  0xa0   :  { %110 = dma.vmem_to_hbm [thread:$0]  %s103_s21, 768, %s105_s0, [#allocation3], %s180_s24, %s180_s24, %s181_s25  }
  0xa1   :  { %177 = dma.done.wait [#allocation3], 768  }
  0xa2   :  { %178 = vsyncadd [#allocation3], 4294966528 }
  0xa3   :  { %115 = vsyncpa [#allocation3], 1 }

</bundles_post_ra>
